<compile_context>
chip_gen: v7x
topology: tpu7x:2x2x1
jax: 0.10.0
libtpu: 0.0.40
codegen_flags: <defaults>
</compile_context>

<pallas_src>
import functools

import jax
import jax.numpy as jnp
from jax import lax
from jax.experimental import pallas as pl
from jax.experimental.pallas import tpu as pltpu


def _cdiv(a, b):
    return -(-a // b)


def _round_up(x, m):
    return ((x + m - 1) // m) * m


def harmonic_kernel(s_ref, out_ref, *, chunk_rows):
    # s_ref  : (3, 1, tr, 128) f32 -- stacked {d2, x0, k} bond tile of one
    #                                 structure (zero padding -> k == 0).
    # out_ref: (1, 1, 8, 128)  f32 -- per-(structure, split) partial sums,
    #                                 resident across the reduction grid axis.
    @pl.when(pl.program_id(2) == 0)
    def _init():
        out_ref[...] = jnp.zeros_like(out_ref)

    tr = s_ref.shape[2]
    n_chunks = tr // chunk_rows

    def body(c, acc):
        r = pl.multiple_of(c * chunk_rows, chunk_rows)
        d2 = s_ref[0, 0, pl.ds(r, chunk_rows), :]
        x0 = s_ref[1, 0, pl.ds(r, chunk_rows), :]
        kk = s_ref[2, 0, pl.ds(r, chunk_rows), :]
        diff = jnp.sqrt(d2) - x0            # feature x - x_0  (EUP sqrt)
        y = kk * diff * diff                # k * (x - x_0)^2, V0 == 0
        # fold chunk_rows sublane rows down to 8 (tile-aligned static slices)
        part = y[0:8, :]
        for g in range(1, chunk_rows // 8):
            part = part + y[g * 8:(g + 1) * 8, :]
        return acc + part

    acc = lax.fori_loop(0, n_chunks, body, jnp.zeros((8, 128), jnp.float32))
    out_ref[0, 0] = out_ref[0, 0] + acc


def harmonic_forward(pos, mapping, atom_types, mapping_batch, x_0_table,
                     k_table, n_structures, *, max_bonds_per_structure=None,
                     tile_rows=1024, assume_sorted=False):
    """Gathers / table lookups / bucketed layout in XLA glue + one Pallas call."""
    M = mapping.shape[1]
    B = int(n_structures)

    # --- per-bond physics inputs (plain-JAX glue; fuses with the gathers) ----
    dr = (pos[mapping[0]] - pos[mapping[1]]).astype(jnp.float32)      # (M, 3)
    d2 = jnp.sum(dr * dr, axis=-1)                                     # (M,)
    t0 = atom_types[mapping[0]]
    t1 = atom_types[mapping[1]]
    x0 = x_0_table[t0, t1].astype(jnp.float32)                         # (M,)
    k = k_table[t0, t1].astype(jnp.float32)                            # (M,)
    batch = mapping_batch.astype(jnp.int32)                            # (M,)

    # --- static tile geometry (balanced padding) ------------------------------
    if max_bonds_per_structure is None:
        # Eager only (forces a device sync); pass a static value when jitting.
        max_bonds_per_structure = int(jnp.max(jnp.bincount(batch, length=B)))
    cap = max(int(max_bonds_per_structure), 1)
    rows_needed = _cdiv(cap, 128)                 # 128-lane rows per structure
    tile_rows_cap = max(8, _round_up(int(tile_rows), 8))
    T = _cdiv(rows_needed, tile_rows_cap)         # bond tiles per structure
    tr = _round_up(_cdiv(rows_needed, T), 8)      # balanced rows per tile
    cap_pad = T * tr * 128                        # padded bonds per structure

    # chunk of sublane rows processed per fused in-kernel step (divides tr)
    chunk = 64
    while chunk > 8 and tr % chunk:
        chunk //= 2

    # split the reduction axis across both cores when there is only 1 structure
    split = 2 if (B == 1 and T >= 2 and T % 2 == 0) else 1
    t_per_split = T // split

    # --- structure-sorted, block-aligned bucketed layout ----------------------
    # Structure b owns slots [b*cap_pad, b*cap_pad + count[b]); the rest is
    # zero padding (k == 0 => zero energy).  Out-of-range structure ids are
    # dropped by .at[].set's OOB-drop default, matching segment_sum.
    counts = jnp.bincount(batch, length=B)
    starts = jnp.cumsum(counts) - counts
    if assume_sorted:
        sorted_batch = batch
        vals = jnp.stack([d2, x0, k])                                  # (3, M)
    else:
        order = jnp.argsort(batch)                # stable in jnp
        sorted_batch = batch[order]
        vals = jnp.stack([d2[order], x0[order], k[order]])
    pos_within = (jnp.arange(M, dtype=jnp.int32)
                  - starts[sorted_batch].astype(jnp.int32))
    dest = sorted_batch * cap_pad + pos_within
    flat = jnp.zeros((3, B * cap_pad), jnp.float32).at[:, dest].set(vals)
    slabs = flat.reshape(3, B, T * tr, 128)       # single stacked input array

    # --- Pallas call -----------------------------------------------------------
    in_spec = pl.BlockSpec(
        (3, 1, tr, 128), lambda b, s, t: (0, b, s * t_per_split + t, 0))
    out_spec = pl.BlockSpec((1, 1, 8, 128), lambda b, s, t: (b, s, 0, 0))

    partials = pl.pallas_call(
        functools.partial(harmonic_kernel, chunk_rows=chunk),
        out_shape=jax.ShapeDtypeStruct((B, split, 8, 128), jnp.float32),
        grid=(B, split, t_per_split),
        in_specs=[in_spec],
        out_specs=out_spec,
        compiler_params=pltpu.CompilerParams(
            dimension_semantics=("parallel", "parallel", "arbitrary")),
        cost_estimate=pl.CostEstimate(
            flops=6 * B * cap_pad,
            transcendentals=B * cap_pad,
            bytes_accessed=3 * 4 * B * cap_pad + 4 * B * split * 8 * 128),
    )(slabs)

    # final tiny (split * 1024)-way reduce per structure in XLA glue
    return partials.reshape(B, -1).sum(axis=1)    # (n_structures,)


def reference_forward(pos, mapping, atom_types, mapping_batch,
                      x_0_table, k_table, n_structures):
    dr = pos[mapping[0]] - pos[mapping[1]]
    dist = jnp.sqrt(jnp.sum(dr * dr, axis=-1))
    t0, t1 = atom_types[mapping[0]], atom_types[mapping[1]]
    y = k_table[t0, t1] * (dist - x_0_table[t0, t1]) ** 2
    return jax.ops.segment_sum(y, mapping_batch, num_segments=n_structures)


if __name__ == "__main__":
    key = jax.random.PRNGKey(0)
    k_pos, k_types, k_pos2, k_types2, k_map2 = jax.random.split(key, 5)

    # ---- test 1: tiny 2-structure batch (sorted mapping_batch) -------------
    n_atoms = 10          # beads over 2 frames
    n_structures = 2      # frames / batch size
    max_type = 4          # atom types in 0..4 -> tables are (5, 5)

    pos = jax.random.normal(k_pos, (n_atoms, 3), dtype=jnp.float32) * 2.0
    atom_types = jax.random.randint(k_types, (n_atoms,), 0, max_type + 1)

    # bond index mapping (order_map=2, n_mapping=8); first 4 bonds in frame 0
    mapping = jnp.array(
        [[0, 1, 2, 3, 5, 6, 7, 8],
         [1, 2, 3, 4, 6, 7, 8, 9]], dtype=jnp.int32)
    mapping_batch = jnp.array([0, 0, 0, 0, 1, 1, 1, 1], dtype=jnp.int32)

    # deterministic Harmonic "statistics" tables, shape (max_type+1,)*order
    ti = jnp.arange(max_type + 1, dtype=jnp.float32)
    x_0_table = 1.0 + 0.1 * (ti[:, None] + ti[None, :])       # x_0[a, b]
    k_table = 50.0 + 5.0 * (ti[:, None] * ti[None, :])        # k[a, b]

    energy = harmonic_forward(pos, mapping, atom_types, mapping_batch,
                              x_0_table, k_table, n_structures,
                              assume_sorted=True)
    energy = jax.block_until_ready(energy)
    ref = reference_forward(pos, mapping, atom_types, mapping_batch,
                            x_0_table, k_table, n_structures)
    assert energy.shape == (n_structures,)
    assert jnp.allclose(energy, ref, rtol=1e-5, atol=1e-5)

    # ---- test 2: single structure with enough bonds to exercise multi-tile,
    #      the in-kernel chunked fold, and the megacore reduction split ------
    n_atoms2 = 512
    n_bonds2 = 3000
    pos2 = jax.random.normal(k_pos2, (n_atoms2, 3), dtype=jnp.float32) * 3.0
    atom_types2 = jax.random.randint(k_types2, (n_atoms2,), 0, max_type + 1)
    mapping2 = jax.random.randint(k_map2, (2, n_bonds2), 0, n_atoms2)
    mapping_batch2 = jnp.zeros((n_bonds2,), dtype=jnp.int32)

    energy2 = harmonic_forward(pos2, mapping2, atom_types2, mapping_batch2,
                               x_0_table, k_table, 1,
                               max_bonds_per_structure=n_bonds2,
                               tile_rows=16, assume_sorted=False)
    energy2 = jax.block_until_ready(energy2)
    ref2 = reference_forward(pos2, mapping2, atom_types2, mapping_batch2,
                             x_0_table, k_table, 1)
    assert energy2.shape == (1,)
    assert jnp.allclose(energy2, ref2, rtol=1e-4, atol=1e-2)

    print("KERNEL_OK")
</pallas_src>

<mosaic_0001>
module attributes {stable_mosaic.version = 11 : i64} {
  func.func @harmonic_kernel(%arg0: i32, %arg1: i32, %arg2: i32, %arg3: memref<3x1x8x128xf32, #tpu.memory_space<vmem>>, %arg4: memref<1x1x8x128xf32, #tpu.memory_space<vmem>>) attributes {dimension_semantics = [#tpu.dimension_semantics<parallel>, #tpu.dimension_semantics<parallel>, #tpu.dimension_semantics<arbitrary>], iteration_bounds = array<i64: 2, 1, 1>, scalar_prefetch = 0 : i64, scratch_operands = 0 : i64, tpu.core_type = #tpu.core_type<tc>, window_params = [{transform_indices = @transform_0, window_bounds = array<i64: 3, 1, 8, 128>}, {transform_indices = @transform_1, window_bounds = array<i64: 1, 1, 8, 128>}]} {
    %c0_i32 = arith.constant 0 : i32
    %0 = arith.cmpi eq, %arg2, %c0_i32 : i32
    %1 = arith.extui %0 : i1 to i32
    %c0_i32_0 = arith.constant 0 : i32
    %2 = arith.cmpi ne, %1, %c0_i32_0 : i32
    scf.if %2 {
      %cst_16 = arith.constant 0.000000e+00 : f32
      %26 = vector.broadcast %cst_16 : f32 to vector<1x1x8x128xf32>
      %c0_17 = arith.constant 0 : index
      %c0_18 = arith.constant 0 : index
      %c0_19 = arith.constant 0 : index
      %c0_20 = arith.constant 0 : index
      %27 = vector.load %arg4[%c0_17, %c0_18, %c0_19, %c0_20] : memref<1x1x8x128xf32, #tpu.memory_space<vmem>>, vector<1x1x8x128xf32>
      tpu.vector_store %arg4[%c0_17, %c0_18, %c0_19, %c0_20], %26 {strides = array<i32>} : memref<1x1x8x128xf32, #tpu.memory_space<vmem>>, vector<1x1x8x128xf32>,
    } else {
    }
    %cst = arith.constant 0.000000e+00 : f32
    %3 = vector.broadcast %cst : f32 to vector<8x128xf32>
    %c0_i32_1 = arith.constant 0 : i32
    %c8_i32 = arith.constant 8 : i32
    %4 = arith.muli %c0_i32_1, %c8_i32 : i32
    %5 = tpu.assume_multiple %4, 8 : i32
    %c0 = arith.constant 0 : index
    %c0_2 = arith.constant 0 : index
    %6 = arith.index_cast %5 : i32 to index
    %c0_3 = arith.constant 0 : index
    %7 = vector.load %arg3[%c0, %c0_2, %6, %c0_3] : memref<3x1x8x128xf32, #tpu.memory_space<vmem>>, vector<1x1x8x128xf32>
    %8 = vector.shape_cast %7 : vector<1x1x8x128xf32> to vector<8x128xf32>
    %c1 = arith.constant 1 : index
    %c0_4 = arith.constant 0 : index
    %9 = arith.index_cast %5 : i32 to index
    %c0_5 = arith.constant 0 : index
    %10 = vector.load %arg3[%c1, %c0_4, %9, %c0_5] : memref<3x1x8x128xf32, #tpu.memory_space<vmem>>, vector<1x1x8x128xf32>
    %11 = vector.shape_cast %10 : vector<1x1x8x128xf32> to vector<8x128xf32>
    %c2 = arith.constant 2 : index
    %c0_6 = arith.constant 0 : index
    %12 = arith.index_cast %5 : i32 to index
    %c0_7 = arith.constant 0 : index
    %13 = vector.load %arg3[%c2, %c0_6, %12, %c0_7] : memref<3x1x8x128xf32, #tpu.memory_space<vmem>>, vector<1x1x8x128xf32>
    %14 = vector.shape_cast %13 : vector<1x1x8x128xf32> to vector<8x128xf32>
    %15 = math.sqrt %8 : vector<8x128xf32>
    %16 = arith.subf %15, %11 : vector<8x128xf32>
    %17 = arith.mulf %14, %16 : vector<8x128xf32>
    %18 = arith.mulf %17, %16 : vector<8x128xf32>
    %19 = arith.addf %3, %18 : vector<8x128xf32>
    %c1_i32 = arith.constant 1 : i32
    %c0_8 = arith.constant 0 : index
    %c0_9 = arith.constant 0 : index
    %c0_10 = arith.constant 0 : index
    %c0_11 = arith.constant 0 : index
    %20 = vector.load %arg4[%c0_8, %c0_9, %c0_10, %c0_11] : memref<1x1x8x128xf32, #tpu.memory_space<vmem>>, vector<1x1x8x128xf32>
    %21 = vector.shape_cast %20 : vector<1x1x8x128xf32> to vector<8x128xf32>
    %22 = arith.addf %21, %19 : vector<8x128xf32>
    %c0_12 = arith.constant 0 : index
    %c0_13 = arith.constant 0 : index
    %c0_14 = arith.constant 0 : index
    %c0_15 = arith.constant 0 : index
    %23 = vector.load %arg4[%c0_12, %c0_13, %c0_14, %c0_15] : memref<1x1x8x128xf32, #tpu.memory_space<vmem>>, vector<1x1x8x128xf32>
    %24 = vector.shape_cast %23 : vector<1x1x8x128xf32> to vector<8x128xf32>
    %25 = vector.shape_cast %22 : vector<8x128xf32> to vector<1x1x8x128xf32>
    tpu.vector_store %arg4[%c0_12, %c0_13, %c0_14, %c0_15], %25 {strides = array<i32>} : memref<1x1x8x128xf32, #tpu.memory_space<vmem>>, vector<1x1x8x128xf32>,
    return
  }
  func.func @transform_0(%arg0: i32, %arg1: i32, %arg2: i32) -> (i32, i32, i32, i32) {
    %c1_i32 = arith.constant 1 : i32
    %0 = arith.muli %arg1, %c1_i32 : i32
    %1 = arith.addi %0, %arg2 : i32
    %c0_i32 = arith.constant 0 : i32
    %c0_i32_0 = arith.constant 0 : i32
    %c0_i32_1 = arith.constant 0 : i32
    return %c0_i32, %arg0, %1, %c0_i32_0 : i32, i32, i32, i32
  }
  func.func @transform_1(%arg0: i32, %arg1: i32, %arg2: i32) -> (i32, i32, i32, i32) {
    %c0_i32 = arith.constant 0 : i32
    %c0_i32_0 = arith.constant 0 : i32
    %c0_i32_1 = arith.constant 0 : i32
    return %arg0, %arg1, %c0_i32, %c0_i32_0 : i32, i32, i32, i32
  }
}

</mosaic_0001>

<bundles_post_ra>
// kernel: tpu_custom_call.1
= control target key start
LH: loop header
LB: loop body
LE: loop exit
PB: predicated region body
PF: predicated region fallthrough
CT: control target
= control target key end

     0   :  { %6 = vsyncpa [#allocation3], 0  ;;  %s673_s0 = inlined_call_operand.hbm [shape: f32[3,2,8,128], index: 0, kind: input, shape index: {}]   ;;  %s674_s1 = inlined_call_operand.hbm [shape: f32[2,1,8,128], index: 1, kind: output, shape index: {}]  }
   0x1   :  { %8 = vsyncpa [#allocation3 + $0x1], 0 }
   0x2   :  { %9 = vsyncpa [#allocation4], 0 }
   0x3   :  { %11 = vsyncpa [#allocation4 + $0x1], 0  ;;  %s501_s6 = smov 0   ;;  %s503_s7 = smov 0  }
   0x4   :  { %s505_s8 = smov 0   ;;  %s507_s9 = smov 0  }
   0x5   :  { %s509_s10 = smov 0   ;;  %s511_s11 = smov 0  }
   0x6 LB: > { %s289_s12 = sadd.s32 4294967295, %s484_s11   ;;  %s290_s13 = sadd.s32 4294967294, %s484_s11   ;;  %s484_s11 = sphi %s511_s11, %s17_s11   ;;  %s480_s10 = sphi %s509_s10, %s688_s10   ;;  %s476_s9 = sphi %s507_s9, %s687_s9   ;;  %s472_s8 = sphi %s505_s8, %s686_s8   ;;  %s468_s7 = sphi %s503_s7, %s685_s7   ;;  %s464_s6 = sphi %s501_s6, %s684_s6  }
   0x7   : > { %s36_s14 = sadd.s32 1, %s480_s10  ;;  %s47_s15 = sadd.s32 1, %s472_s8 }
   0x8   : > { %p38_p0 = scmp.ge.s32.totalorder %s36_s14, 2  ;;  %p54_p1 = scmp.ne.s32.totalorder %s472_s8, %s468_s7 }
   0x9   : > { %p55_p2 = scmp.eq.s32.totalorder %s484_s11, 0  ;;  %p60_p3 = scmp.ne.s32.totalorder %s468_s7, %s464_s6 }
   0xa   : > { %s690_s14 = smov (%p38_p0, %s36_s14), 0  ;;  %p61_p5 = scmp.eq.s32.totalorder %s289_s12, 0 }
   0xb   : > { %p542_p4 = por %p55_p2, %p54_p1  ;;  %s42_s17 = ssub.s32 %s480_s10, %s690_s14 }
   0xc   : > { %p86_p6 = scmp.eq.s32.totalorder %s289_s12, 1  ;;  %p45_p7 = scmp.eq.s32.totalorder %s42_s17, 0 }
   0xd   : > { %p548_p8 = por %p61_p5, %p60_p3  ;;  %p92_p10 = scmp.eq.s32.totalorder %s290_s13, 1 }
   0xe   : > { %p552_p9 = por %p86_p6, %p54_p1  ;;  %p316_p13 = scmp.lt.s32.totalorder %s484_s11, 2 }
   0xf   : > { %s557_s20 = scalar_select %p45_p7, %s472_s8, %s47_s15  }
  0x10   : > { %s678_s19 = scalar_select %p552_p9, 1, 0 }
  0x11   : > { %p559_p11 = por %p92_p10, %p60_p3  ;;  %s112_s22 = sand.u32 1, %s472_s8  }
  0x12   : > { %s302_s23 = smul.u32 24, %s112_s22  ;;  %s293_s24 = sshll.u32 %s480_s10, 7 }
  0x13   : > { %s679_s21 = scalar_select %p559_p11, 1, 0 }
  0x14   : > { %p569_p0 = pnand %p316_p13, %p542_p4  ;;  %s576_s28 = scalar_lea.hbm %s673_s0, %s293_s24 }
  0x15   : > { %s116_s29 = scalar_lea.vmem [#allocation2], %s302_s23  ;;  %s580_s2 = scalar_lea.sflag [#allocation3], %s112_s22 }
  0x16   : > { %s124_s30 = sshll.u32 %s116_s29, 4  ;;  %s372_s3 = scalar_lea.hbm %s576_s28, 384  ;;  %s578_s30 = int_to_ptr.vmem [resolvable:$true] %s124_s30 }
  0x17   : > { %p373_p1 = scmp.ne.s32.totalorder %s576_s28, %s372_s3  ;;  %p374_p2 = pneg %p569_p0 }
  0x18   : > { %s377_s12 = scalar_lea.hbm %s673_s0, 768  ;;  %p378_p5 = scmp.lt.u32.totalorder %s576_s28, %s673_s0 }
  0x19   : > { %p375_p3 = pnand %p374_p2, %p373_p1  ;;  %p379_p6 = scmp.lt.u32.totalorder %s377_s12, %s372_s3 }
  0x1a   : > { %p381_p10 = scmp.lt.u32.totalorder %s372_s3, %s576_s28 }
  0x1b   : > { %p376_p4 = pneg %p375_p3  ;;  %p380_p7 = por %p379_p6, %p378_p5 }
  0x1d   : > { %p382_p13 = por %p381_p10, %p380_p7 }
  0x1f   : > { %p383_p12 = pnand %p382_p13, %p376_p4 }
  0x21   : > { %386 = shalt.err (!%p383_p12)
}
  0x22   : > { %s387_s16 = scalar_lea.vmem %s578_s30, 384  ;;  %s486_s17 = smov [#allocation2]  }
  0x23   : > { %p388_p1 = scmp.ne.s32.totalorder %s578_s30, %s387_s16  ;;  %s392_s22 = sshll.u32 %s486_s17, 4  ;;  %s393_s22 = int_to_ptr.vmem [resolvable:$false] %s392_s22 }
  0x24   : > { %s394_s23 = scalar_lea.vmem %s393_s22, 768  ;;  %p395_p9 = scmp.lt.s32.totalorder %s578_s30, %s393_s22 }
  0x25   : > { %p390_p3 = pnand %p388_p1, %p374_p2  ;;  %p396_p5 = scmp.lt.s32.totalorder %s394_s23, %s387_s16 }
  0x27   : > { %p391_p11 = pneg %p390_p3  ;;  %p397_p6 = por %p396_p5, %p395_p9 }
  0x29   : > { %p398_p7 = pnand %p397_p6, %p391_p11 }
  0x2b   : > { %401 = shalt.err (!%p398_p7)
}
  0x2c   : > { %s487_s24 = smov 256   ;;  %s488_s26 = smov 128  }
  0x2d   : > { %s489_s27 = smov 8   ;;  %p294_p12 = scmp.ge.s32.totalorder %s484_s11, 1 }
  0x2e   : > { %311 = dma.hbm_to_vmem [thread:$0]  (!%p569_p0), %s576_s28, 384, %s578_s30, %s580_s2, %s487_s24, %s488_s26, %s489_s27  }
  0x2f   : > { %p132_p2 = scmp.lt.s32.totalorder %s484_s11, 3 }
  0x31   : > { %p133_p4 = pnand %p294_p12, %p132_p2 }
  0x32   : > { %s611_s29 = sand.u32 (!%p133_p4), 1, %s468_s7  }
  0x33   : > { %136 = sbr.rel (%p133_p4) target bundleno = 95 (0x5f), region = 24  ;;  %s139_s4 = scalar_lea.sflag (!%p133_p4), [#allocation3], %s611_s29 }
  0x34   : > { %s303_s3 = smul.u32 (!%p133_p4), 24, %s611_s29 }
  0x36   : > { %s142_s5 = scalar_lea.vmem (!%p133_p4), [#allocation2], %s303_s3 }
  0x3a   : > { %455 = dma.done.wait (%p548_p8), %s139_s4, 384  }
  0x3b   : > { %457 = vsyncadd (%p548_p8), %s139_s4, 4294966912  ;;  %v167_v0 = vld [vmem:[%s142_s5] sm:$0xff]  ;;  %s295_s25 = sshll.u32 %s611_s29, 3  ;;  %v296_v4 = vld [vmem:[%s142_s5 + $0x8] sm:$0xff]  ;;  %s299_s18 = sshll.u32 %s476_s9, 7 }
  0x3c   : > { %370 = vrsqrt.f32 %v167_v0  ;;  %vm176_vm0 = vcmp.eq.f32.partialorder %v167_v0, inf  ;;  %v179_v2 = vand.u32 2147483648, %v167_v0  ;;  %vm178_vm1 = vcmp.eq.f32.partialorder %v167_v0, 0.0  ;;  %v297_v6 = vld [vmem:[%s142_s5 + $0x10] sm:$0xff]  ;;  %s160_s28 = scalar_lea.vmem [#allocation5], %s295_s25  ;;  %s624_s13 = scalar_lea.hbm %s674_s1, %s299_s18 }
  0x3d   : > { %s203_s30 = sshll.u32 %s160_s28, 4  ;;  %s189_s15 = scalar_lea.sflag [#allocation4], %s611_s29  ;;  %s626_s30 = int_to_ptr.vmem [resolvable:$true] %s203_s30 }
  0x3e   : > { %s402_s16 = scalar_lea.vmem %s626_s30, 128  ;;  %p681_p9 = scmp.ne.s32.totalorder %s678_s19, 0 }
  0x3f   : > { %p403_p8 = scmp.ne.s32.totalorder %s626_s30, %s402_s16  ;;  %s490_s9 = smov [#allocation5]  }
  0x40   : > { %s406_s17 = sshll.u32 %s490_s9, 4  ;;  %s407_s17 = int_to_ptr.vmem [resolvable:$false] %s406_s17 }
  0x41   : > { %p404_p11 = pnand %p403_p8, %p681_p9  ;;  %s408_s22 = scalar_lea.vmem %s407_s17, 256 }
  0x42   : > { %p409_p10 = scmp.lt.s32.totalorder %s626_s30, %s407_s17  ;;  %p410_p13 = scmp.lt.s32.totalorder %s408_s22, %s402_s16 }
  0x43   : > { %p405_p0 = pneg %p404_p11 }
  0x44   : > { %p411_p1 = por %p410_p13, %p409_p10 }
  0x46   : > { %v371_v1 = vpop.eup %370  ;;  %p412_p3 = pnand %p411_p1, %p405_p0 }
  0x47   : > { %v175_v3 = vmul.f32 %v371_v1, %v167_v0 }
  0x49   : > { %v177_v5 = vsel %vm176_vm0, %v167_v0, %v175_v3 }
  0x4a   : > { %v180_v7 = vsel %vm178_vm1, %v179_v2, %v177_v5 }
  0x4b   : > { %v181_v8 = vsub.f32 %v180_v7, %v296_v4 }
  0x4d   : > { %v182_v9 = vmul.f32 %v297_v6, %v181_v8 }
  0x4f   : > { %v183_v10 = vmul.f32 %v182_v9, %v181_v8 }
  0x51   : > { %187 = vst [vmem:[%s160_s28] sm:$0xff] %v183_v10 }
  0x52   : > { %415 = shalt.err (!%p412_p3)
}
  0x53   : > { %s416_s23 = scalar_lea.hbm %s624_s13, 128  ;;  %s420_s27 = scalar_lea.hbm %s674_s1, 256 }
  0x54   : > { %p417_p5 = scmp.ne.s32.totalorder %s624_s13, %s416_s23  ;;  %p421_p12 = scmp.lt.u32.totalorder %s624_s13, %s674_s1 }
  0x55   : > { %p422_p2 = scmp.lt.u32.totalorder %s420_s27, %s416_s23  ;;  %p424_p8 = scmp.lt.u32.totalorder %s416_s23, %s624_s13 }
  0x56   : > { %p418_p6 = pnand %p417_p5, %p681_p9 }
  0x57   : > { %p423_p4 = por %p422_p2, %p421_p12 }
  0x58   : > { %p419_p7 = pneg %p418_p6 }
  0x59   : > { %p425_p11 = por %p424_p8, %p423_p4 }
  0x5b   : > { %p426_p0 = pnand %p425_p11, %p419_p7 }
  0x5d   : > { %429 = shalt.err (!%p426_p0)
}
  0x5e   : > { %306 = dma.vmem_to_hbm [thread:$0]  (%p681_p9), %s626_s30, 128, %s624_s13, %s189_s15  }
  0x5f PF: > { %s215_s4 = sand.u32 1, %s464_s6   ;;  %p682_p10 = scmp.ne.s32.totalorder %s679_s21, 0 }
  0x60   : > { %p683_p13 = scmp.ge.s32.totalorder %s484_s11, 2  ;;  %s216_s5 = scalar_lea.sflag [#allocation4], %s215_s4 }
  0x62   : > { %p313_p1 = pnand %p683_p13, %p682_p10 }
  0x64   : > { %459 = dma.done.wait (!%p313_p1), %s216_s5, 128  }
  0x65   : > { %461 = vsyncadd (!%p313_p1), %s216_s5, 4294967168  ;;  %s17_s11 = sadd.s32 1, %s484_s11   ;;  %s684_s6 = smov %s468_s7 }
  0x66   : > { %p14_p3 = scmp.ge.s32.totalorder %s17_s11, 4   ;;  %s685_s7 = smov %s472_s8 }
  0x67   : > { %s686_s8 = smov %s557_s20  ;;  %s687_s9 = smov %s480_s10 }
  0x68   : > { %s688_s10 = smov %s690_s14  ;;  %16 = sbr.rel (!%p14_p3) target bundleno = 6 (0x6), region = 75 }
  0x6f   :  { %221 = vsyncpa [#allocation3], 1 }
  0x70   :  { %223 = vsyncpa [#allocation3 + $0x1], 1 }
  0x71   :  { %224 = vsyncpa [#allocation4], 1 }
  0x72   :  { %226 = vsyncpa [#allocation4 + $0x1], 1 }

</bundles_post_ra>
